<compile_context>
chip_gen: v6e
topology: v6e:2x2x1
jax: 0.10.0
libtpu: 0.0.40
codegen_flags: <defaults>
</compile_context>

<pallas_src>
import functools

import jax
import jax.numpy as jnp
from jax import lax
from jax.experimental import pallas as pl
from jax.experimental.pallas import tpu as pltpu


def _vmem_bytes(shape, itemsize=4):
    """Rough VMEM footprint of a tile after (8, 128) padding."""
    s = list(shape)
    s[-1] = -(-s[-1] // 128) * 128
    if len(s) > 1:
        s[-2] = -(-s[-2] // 8) * 8
    n = itemsize
    for d in s:
        n *= d
    return n


def _vmem_budget_bytes():
    """Generation-aware scoped-VMEM budget: ~75% of physical VMEM
    (≈96 MiB on v5e/v6e, ≈48 MiB on v7x), with a safe default if the query
    is unavailable."""
    cap = 64 << 20  # conservative default (v7x physical per-core VMEM)
    try:
        cap = int(pltpu.get_tpu_info().vmem_capacity_bytes)
    except Exception:
        pass
    return (cap * 3) // 4


def _pick_cout_block(cout):
    """Largest Cout block dividing Cout that is a multiple of 8 (or Cout
    itself), capped at 128 — fills the MXU M dim and bounds per-step VMEM."""
    if cout <= 128:
        return cout
    for d in range(128, 7, -8):
        if cout % d == 0:
            return d
    return cout  # pathological non-factorable Cout; VMEM guard still applies


def _pick_cin_block(cin, flat, itemsize, budget):
    """Contraction (Cin) block. Blocking requires a multiple of 128 so the
    pointwise-weight tile stays (8,128)-legal; otherwise use all of Cin."""
    limit = budget // 4  # x double-buffer share of the budget
    if 2 * cin * flat * itemsize <= limit or cin % 128 != 0:
        return cin
    best = 128
    d = 256
    while d <= cin:
        if cin % d == 0 and 2 * d * flat * itemsize <= limit:
            best = d
        d += 128
    return best


# -----------------------------------------------------------------------------
# Fast path: stride == 1 and output spatial size == input spatial size.
# Layout: (channels, H*W) with the flattened spatial axis on the lane dimension
# (multiple of 128 -> dense vregs, unmasked output stores).
# -----------------------------------------------------------------------------
def _bsconv_same_kernel(x_ref, pw_w_ref, pw_b_ref, dw_w_ref, dw_b_ref, mask_ref,
                        o_ref, z_ref, *, W, KH, KW, padding):
    k = pl.program_id(2)

    @pl.when(k == 0)
    def _():
        z_ref[...] = jnp.zeros_like(z_ref)

    # ---- pointwise 1x1 conv, Cin-blocked: (Cb, Cin_b) @ (Cin_b, H*W) on the
    # MXU with native-dtype operands and f32 accumulation (no f32 pre-casts).
    z_ref[...] += jnp.dot(pw_w_ref[...], x_ref[...],
                          preferred_element_type=jnp.float32)

    @pl.when(k == pl.num_programs(2) - 1)
    def _():
        flat = z_ref.shape[1]                                  # H*W, mult of 128
        z = z_ref[...] + pw_b_ref[...].astype(jnp.float32)     # (Cb, flat)

        # ---- depthwise KxK (stride 1, 'same'): tap (kh, kw) is a flat lane
        # shift of z by (kh-p)*W + (kw-p); padding-ring contributions are
        # killed by precomputed 0/1 masks (2-D, one row per tap). The center
        # tap's mask is all-ones, so its multiply is skipped.
        # TODO(synk): on v6e/v7x run the roll/tap path in bf16 (half the vregs
        # through XLU/VPU) and/or generate masks in-kernel from iota compares.
        acc = jnp.zeros_like(z)
        for kh in range(KH):
            for kw in range(KW):
                dr, dc = kh - padding, kw - padding
                idx = kh * KW + kw
                shift = dr * W + dc
                amt = (-shift) % flat                          # jnp.roll convention
                shifted = z if amt == 0 else pltpu.roll(z, amt, 1)  # XLU slot
                tap = dw_w_ref[:, idx:idx + 1].astype(jnp.float32)  # (Cb, 1)
                contrib = shifted * tap
                if dr != 0 or dc != 0:                         # skip all-ones mask
                    contrib = contrib * mask_ref[idx:idx + 1, :]
                acc = acc + contrib
        acc = acc + dw_b_ref[...].astype(jnp.float32)
        o_ref[...] = acc.astype(o_ref.dtype)                   # lane-dense store


# -----------------------------------------------------------------------------
# General fallback (stride != 1 or non-'same' padding). NCHW-native with a
# zero-halo VMEM scratch; pointwise is one lane-dense matmul, depthwise runs at
# stride 1 on contiguous windows and is subsampled once; lane-dense flat store.
# -----------------------------------------------------------------------------
def _bsconv_planar_kernel(x_ref, pw_w_ref, pw_b_ref, dw_w_ref, dw_b_ref, o_ref,
                          zpad_ref, *, H, W, KH, KW, stride, padding):
    Cb = zpad_ref.shape[0]
    p = padding
    Hp, Wp = H + 2 * p, W + 2 * p
    Hs1, Ws1 = Hp - KH + 1, Wp - KW + 1

    if p > 0:  # zero only the halo ring; the interior is fully overwritten
        zpad_ref[:, :p, :] = jnp.zeros((Cb, p, Wp), jnp.float32)
        zpad_ref[:, H + p:, :] = jnp.zeros((Cb, p, Wp), jnp.float32)
        zpad_ref[:, :, :p] = jnp.zeros((Cb, Hp, p), jnp.float32)
        zpad_ref[:, :, W + p:] = jnp.zeros((Cb, Hp, p), jnp.float32)

    # pointwise 1x1 conv: ONE lane-dense matmul over the whole image (hoisted
    # out of the old per-row loop), then a single planar store into the halo.
    z = jnp.dot(pw_w_ref[...], x_ref[...], preferred_element_type=jnp.float32)
    z = z + pw_b_ref[...].astype(jnp.float32)                  # (Cb, H*W)
    zpad_ref[:, p:p + H, p:p + W] = z.reshape(Cb, H, W)

    # depthwise KxK at stride 1 (contiguous windows), then subsample once.
    acc = jnp.zeros((Cb, Hs1, Ws1), jnp.float32)
    for kh in range(KH):
        for kw in range(KW):
            win = zpad_ref[:, pl.ds(kh, Hs1), pl.ds(kw, Ws1)]
            tap = dw_w_ref[:, kh * KW + kw:kh * KW + kw + 1].astype(jnp.float32)
            acc = acc + win * tap[:, :, None]
    if stride > 1:
        # TODO(synk): replace this value-level strided subsample with an MXU
        # column-selection matmul for a fully lane-friendly stride>1 path.
        acc = acc[:, ::stride, ::stride]
    acc = acc + dw_b_ref[...].astype(jnp.float32)[:, :, None]
    o_ref[...] = acc.reshape(Cb, acc.shape[1] * acc.shape[2]).astype(o_ref.dtype)


# -----------------------------------------------------------------------------
# Wrapper
# -----------------------------------------------------------------------------
def bsconv_pallas(x, pw_w, pw_b, dw_w, dw_b, *, stride, padding):
    """x: (N, Cin, H, W) NCHW. pw_w: (Cout, Cin, 1, 1). dw_w: (Cout, 1, KH, KW).
    Returns (N, Cout, Ho, Wo) NCHW."""
    N, Cin, H, W = x.shape
    Cout = pw_w.shape[0]
    KH, KW = dw_w.shape[2], dw_w.shape[3]
    Ho = (H + 2 * padding - KH) // stride + 1
    Wo = (W + 2 * padding - KW) // stride + 1
    flat = H * W
    itemsize = x.dtype.itemsize
    budget = _vmem_budget_bytes()

    # Kernel-friendly parameter layouts (tiny tensors; negligible cost). All
    # 2-D — no trailing size-1 lane dims (a trailing 1 pads to 128 lanes).
    pw_w_k = pw_w[:, :, 0, 0].astype(x.dtype)                  # (Cout, Cin)
    pw_b_k = pw_b.reshape(Cout, 1).astype(jnp.float32)
    dw_w_k = dw_w[:, 0].reshape(Cout, KH * KW).astype(jnp.float32)
    dw_b_k = dw_b.reshape(Cout, 1).astype(jnp.float32)

    cb = _pick_cout_block(Cout)                                # sublane axis block
    n_cblk = Cout // cb

    fast = (stride == 1 and Ho == H and Wo == W and flat % 128 == 0)

    if fast:
        cin_b = _pick_cin_block(Cin, flat, itemsize, budget)
        n_kblk = Cin // cin_b
        x_flat = x.reshape(N, Cin, flat)        # free reshape: no HBM transpose

        # Precompute 0/1 tap masks as a single 2-D (KH*KW, flat) array
        # (9->16 sublane padding instead of the old 3-D layout's 8x blowup).
        f = jnp.arange(flat, dtype=jnp.int32)
        row, col = f // W, f % W
        masks = []
        for kh in range(KH):
            for kw in range(KW):
                dr, dc = kh - padding, kw - padding
                ok = ((row + dr >= 0) & (row + dr < H) &
                      (col + dc >= 0) & (col + dc < W))
                masks.append(ok.astype(jnp.float32))
        masks = jnp.stack(masks)                               # (KH*KW, flat)

        # Explicit VMEM budget incl. the ~3 full-size f32 temporaries
        # (z+bias / shifted / acc) that live alongside the pipelined buffers.
        need = (2 * _vmem_bytes((cin_b, flat), itemsize)       # x, double buffered
                + 2 * _vmem_bytes((cb, flat), itemsize)        # out, double buffered
                + _vmem_bytes((cb, flat), 4)                   # z accumulator scratch
                + 3 * _vmem_bytes((cb, flat), 4)               # in-register temporaries
                + 2 * _vmem_bytes((KH * KW, flat), 4)          # tap masks
                + 2 * (_vmem_bytes((cb, cin_b), itemsize)
                       + _vmem_bytes((cb, KH * KW), 4)
                       + 2 * _vmem_bytes((cb, 1), 4)))
        if need > budget:
            # TODO(synk): tile H*W into lane blocks with a (padding*W+padding)
            # halo so very large images also fit v7x's 64 MiB VMEM.
            raise NotImplementedError(
                f"BSConv fast path needs ~{need >> 20} MiB VMEM "
                f"(budget {budget >> 20} MiB); spatial tiling not implemented.")

        kernel = functools.partial(_bsconv_same_kernel, W=W, KH=KH, KW=KW,
                                   padding=padding)
        out = pl.pallas_call(
            kernel,
            out_shape=jax.ShapeDtypeStruct((N, Cout, flat), x.dtype),
            grid_spec=pltpu.PrefetchScalarGridSpec(
                num_scalar_prefetch=0,
                grid=(N, n_cblk, n_kblk),                      # reduction axis last
                in_specs=[
                    pl.BlockSpec((pl.Squeezed(), cin_b, flat),
                                 lambda n, j, kk: (n, kk, 0)),
                    pl.BlockSpec((cb, cin_b), lambda n, j, kk: (j, kk)),
                    pl.BlockSpec((cb, 1), lambda n, j, kk: (j, 0)),
                    pl.BlockSpec((cb, KH * KW), lambda n, j, kk: (j, 0)),
                    pl.BlockSpec((cb, 1), lambda n, j, kk: (j, 0)),
                    pl.BlockSpec((KH * KW, flat), lambda n, j, kk: (0, 0)),
                ],
                out_specs=pl.BlockSpec((pl.Squeezed(), cb, flat),
                                       lambda n, j, kk: (n, j, 0)),
                scratch_shapes=[pltpu.VMEM((cb, flat), jnp.float32)],
            ),
            compiler_params=pltpu.CompilerParams(
                dimension_semantics=("parallel", "parallel", "arbitrary"),
                vmem_limit_bytes=budget),
        )(x_flat, pw_w_k, pw_b_k, dw_w_k, dw_b_k, masks)
        return out.reshape(N, Cout, Ho, Wo)

    # ---- general fallback ----
    Hp, Wp = H + 2 * padding, W + 2 * padding
    Hs1, Ws1 = Hp - KH + 1, Wp - KW + 1
    need = (2 * _vmem_bytes((Cin, flat), itemsize)
            + 2 * _vmem_bytes((cb, Ho * Wo), itemsize)
            + _vmem_bytes((cb, Hp, Wp), 4)                     # halo scratch
            + 2 * _vmem_bytes((cb, Hs1, Ws1), 4)               # depthwise temporaries
            + _vmem_bytes((cb, flat), 4)                       # pointwise result
            + 2 * (_vmem_bytes((cb, Cin), itemsize)
                   + _vmem_bytes((cb, KH * KW), 4)
                   + 2 * _vmem_bytes((cb, 1), 4)))
    if need > budget:
        # TODO(synk): tile the image into row strips with a (KH-1)-row halo.
        raise NotImplementedError(
            f"BSConv fallback path needs ~{need >> 20} MiB VMEM "
            f"(budget {budget >> 20} MiB); strip-mined tiling not implemented.")

    x_flat = x.reshape(N, Cin, flat)
    kernel = functools.partial(_bsconv_planar_kernel, H=H, W=W, KH=KH, KW=KW,
                               stride=stride, padding=padding)
    out = pl.pallas_call(
        kernel,
        out_shape=jax.ShapeDtypeStruct((N, Cout, Ho * Wo), x.dtype),
        grid_spec=pltpu.PrefetchScalarGridSpec(
            num_scalar_prefetch=0,
            grid=(N, n_cblk),
            in_specs=[
                pl.BlockSpec((pl.Squeezed(), Cin, flat), lambda n, j: (n, 0, 0)),
                pl.BlockSpec((cb, Cin), lambda n, j: (j, 0)),
                pl.BlockSpec((cb, 1), lambda n, j: (j, 0)),
                pl.BlockSpec((cb, KH * KW), lambda n, j: (j, 0)),
                pl.BlockSpec((cb, 1), lambda n, j: (j, 0)),
            ],
            out_specs=pl.BlockSpec((pl.Squeezed(), cb, Ho * Wo),
                                   lambda n, j: (n, j, 0)),
            scratch_shapes=[pltpu.VMEM((cb, Hp, Wp), jnp.float32)],
        ),
        compiler_params=pltpu.CompilerParams(
            dimension_semantics=("parallel", "parallel"),
            vmem_limit_bytes=budget),
    )(x_flat, pw_w_k, pw_b_k, dw_w_k, dw_b_k)
    return out.reshape(N, Cout, Ho, Wo)


def bsconv_reference(x, pw_w, pw_b, dw_w, dw_b, *, stride, padding):
    """Plain-JAX reference (NCHW), mirrors PyTorch Conv2d semantics."""
    Cout = pw_w.shape[0]
    z = lax.conv_general_dilated(
        x, pw_w, window_strides=(1, 1), padding='VALID',
        dimension_numbers=('NCHW', 'OIHW', 'NCHW'))
    z = z + pw_b.reshape(1, Cout, 1, 1)
    y = lax.conv_general_dilated(
        z, dw_w, window_strides=(stride, stride),
        padding=[(padding, padding), (padding, padding)],
        dimension_numbers=('NCHW', 'OIHW', 'NCHW'),
        feature_group_count=Cout)
    return y + dw_b.reshape(1, Cout, 1, 1)


if __name__ == "__main__":
    def _run_case(key, N, Cin, Cout, H, W, K, stride, padding):
        k_x, k_pw, k_pwb, k_dw, k_dwb = jax.random.split(key, 5)
        x = jax.random.normal(k_x, (N, Cin, H, W), jnp.float32)
        pw_w = jax.random.normal(k_pw, (Cout, Cin, 1, 1), jnp.float32) * 0.1
        pw_b = jax.random.normal(k_pwb, (Cout,), jnp.float32) * 0.1
        dw_w = jax.random.normal(k_dw, (Cout, 1, K, K), jnp.float32) * 0.1
        dw_b = jax.random.normal(k_dwb, (Cout,), jnp.float32) * 0.1
        out = bsconv_pallas(x, pw_w, pw_b, dw_w, dw_b,
                            stride=stride, padding=padding)
        out = jax.block_until_ready(out)
        ref = bsconv_reference(x, pw_w, pw_b, dw_w, dw_b,
                               stride=stride, padding=padding)
        assert out.shape == ref.shape, (out.shape, ref.shape)
        err = float(jnp.max(jnp.abs(out - ref)))
        assert err < 1e-4, err

    key = jax.random.PRNGKey(0)
    k1, k2 = jax.random.split(key)
    # BSConv(in_channels=4, out_channels=8, kernel_size=3, stride=1, padding=1)
    _run_case(k1, N=2, Cin=4, Cout=8, H=16, W=16, K=3, stride=1, padding=1)
    # K=5 / p=2, non-square image (parameterized check of the roll+mask path)
    _run_case(k2, N=1, Cin=3, Cout=8, H=16, W=24, K=5, stride=1, padding=2)

    print("KERNEL_OK")
</pallas_src>

<mosaic_0001>
module attributes {stable_mosaic.version = 11 : i64} {
  func.func @_bsconv_same_kernel(%arg0: i32, %arg1: i32, %arg2: i32, %arg3: memref<1x4x256xf32, #tpu.memory_space<vmem>>, %arg4: memref<8x4xf32, #tpu.memory_space<vmem>>, %arg5: memref<8x1xf32, #tpu.memory_space<vmem>>, %arg6: memref<8x9xf32, #tpu.memory_space<vmem>>, %arg7: memref<8x1xf32, #tpu.memory_space<vmem>>, %arg8: memref<9x256xf32, #tpu.memory_space<vmem>>, %arg9: memref<1x8x256xf32, #tpu.memory_space<vmem>>, %arg10: memref<8x256xf32, #tpu.memory_space<vmem>>) attributes {dimension_semantics = [#tpu.dimension_semantics<parallel>, #tpu.dimension_semantics<parallel>, #tpu.dimension_semantics<arbitrary>], iteration_bounds = array<i64: 2, 1, 1>, scalar_prefetch = 0 : i64, scratch_operands = 1 : i64, tpu.core_type = #tpu.core_type<tc>, window_params = [{transform_indices = @transform_0, window_bounds = array<i64: 1, 4, 256>}, {transform_indices = @transform_1, window_bounds = array<i64: 8, 4>}, {transform_indices = @transform_2, window_bounds = array<i64: 8, 1>}, {transform_indices = @transform_3, window_bounds = array<i64: 8, 9>}, {transform_indices = @transform_4, window_bounds = array<i64: 8, 1>}, {pipeline_mode = #tpu.pipeline_mode<synchronous>, transform_indices = @transform_5, window_bounds = array<i64: 9, 256>}, {transform_indices = @transform_6, window_bounds = array<i64: 1, 8, 256>}]} {
    %c0_i32 = arith.constant 0 : i32
    %0 = arith.cmpi eq, %arg2, %c0_i32 : i32
    %1 = arith.extui %0 : i1 to i32
    %c0_i32_0 = arith.constant 0 : i32
    %2 = arith.cmpi ne, %1, %c0_i32_0 : i32
    scf.if %2 {
      %cst_11 = arith.constant 0.000000e+00 : f32
      %13 = vector.broadcast %cst_11 : f32 to vector<8x256xf32>
      %c0_12 = arith.constant 0 : index
      %c0_13 = arith.constant 0 : index
      %14 = vector.load %arg10[%c0_12, %c0_13] : memref<8x256xf32, #tpu.memory_space<vmem>>, vector<8x256xf32>
      tpu.vector_store %arg10[%c0_12, %c0_13], %13 {strides = array<i32>} : memref<8x256xf32, #tpu.memory_space<vmem>>, vector<8x256xf32>,
    } else {
    }
    %c0 = arith.constant 0 : index
    %c0_1 = arith.constant 0 : index
    %3 = vector.load %arg10[%c0, %c0_1] : memref<8x256xf32, #tpu.memory_space<vmem>>, vector<8x256xf32>
    %c0_2 = arith.constant 0 : index
    %c0_3 = arith.constant 0 : index
    %4 = vector.load %arg4[%c0_2, %c0_3] : memref<8x4xf32, #tpu.memory_space<vmem>>, vector<8x4xf32>
    %c0_4 = arith.constant 0 : index
    %c0_5 = arith.constant 0 : index
    %c0_6 = arith.constant 0 : index
    %5 = vector.load %arg3[%c0_4, %c0_5, %c0_6] : memref<1x4x256xf32, #tpu.memory_space<vmem>>, vector<1x4x256xf32>
    %6 = vector.shape_cast %5 : vector<1x4x256xf32> to vector<4x256xf32>
    %cst = arith.constant dense<0.000000e+00> : vector<8x256xf32>
    %7 = tpu.matmul %4, %6, %cst {dimension_numbers = #tpu.dot_dimension_numbers<[1], [0], [0], [1], [0, 0, 1, 1], [], []>} : vector<8x4xf32>, vector<4x256xf32>, vector<8x256xf32> -> vector<8x256xf32>
    %8 = arith.addf %3, %7 : vector<8x256xf32>
    %c0_7 = arith.constant 0 : index
    %c0_8 = arith.constant 0 : index
    %9 = vector.load %arg10[%c0_7, %c0_8] : memref<8x256xf32, #tpu.memory_space<vmem>>, vector<8x256xf32>
    tpu.vector_store %arg10[%c0_7, %c0_8], %8 {strides = array<i32>} : memref<8x256xf32, #tpu.memory_space<vmem>>, vector<8x256xf32>,
    %c0_i32_9 = arith.constant 0 : i32
    %10 = arith.cmpi eq, %arg2, %c0_i32_9 : i32
    %11 = arith.extui %10 : i1 to i32
    %c0_i32_10 = arith.constant 0 : i32
    %12 = arith.cmpi ne, %11, %c0_i32_10 : i32
    scf.if %12 {
      %c0_11 = arith.constant 0 : index
      %c0_12 = arith.constant 0 : index
      %13 = vector.load %arg10[%c0_11, %c0_12] : memref<8x256xf32, #tpu.memory_space<vmem>>, vector<8x256xf32>
      %c0_13 = arith.constant 0 : index
      %c0_14 = arith.constant 0 : index
      %14 = vector.load %arg5[%c0_13, %c0_14] : memref<8x1xf32, #tpu.memory_space<vmem>>, vector<8x1xf32>
      %15 = vector.broadcast %14 : vector<8x1xf32> to vector<8x256xf32>
      %16 = arith.addf %13, %15 : vector<8x256xf32>
      %cst_15 = arith.constant 0.000000e+00 : f32
      %17 = vector.broadcast %cst_15 : f32 to vector<8x256xf32>
      %c17_i32 = arith.constant 17 : i32
      %18 = tpu.dynamic_rotate %16 by %c17_i32 dim 1 : vector<8x256xf32>, i32 -> vector<8x256xf32>
      %c0_16 = arith.constant 0 : index
      %c0_17 = arith.constant 0 : index
      %19 = vector.load %arg6[%c0_16, %c0_17] : memref<8x9xf32, #tpu.memory_space<vmem>>, vector<8x1xf32>
      %20 = vector.broadcast %19 : vector<8x1xf32> to vector<8x256xf32>
      %21 = arith.mulf %18, %20 : vector<8x256xf32>
      %c0_18 = arith.constant 0 : index
      %c0_19 = arith.constant 0 : index
      %22 = vector.load %arg8[%c0_18, %c0_19] : memref<9x256xf32, #tpu.memory_space<vmem>>, vector<1x256xf32>
      %23 = vector.broadcast %22 : vector<1x256xf32> to vector<8x256xf32>
      %24 = arith.mulf %21, %23 : vector<8x256xf32>
      %25 = arith.addf %17, %24 : vector<8x256xf32>
      %c16_i32 = arith.constant 16 : i32
      %26 = tpu.dynamic_rotate %16 by %c16_i32 dim 1 : vector<8x256xf32>, i32 -> vector<8x256xf32>
      %c0_20 = arith.constant 0 : index
      %c1 = arith.constant 1 : index
      %27 = vector.load %arg6[%c0_20, %c1] : memref<8x9xf32, #tpu.memory_space<vmem>>, vector<8x1xf32>
      %28 = vector.broadcast %27 : vector<8x1xf32> to vector<8x256xf32>
      %29 = arith.mulf %26, %28 : vector<8x256xf32>
      %c1_21 = arith.constant 1 : index
      %c0_22 = arith.constant 0 : index
      %30 = vector.load %arg8[%c1_21, %c0_22] : memref<9x256xf32, #tpu.memory_space<vmem>>, vector<1x256xf32>
      %31 = vector.broadcast %30 : vector<1x256xf32> to vector<8x256xf32>
      %32 = arith.mulf %29, %31 : vector<8x256xf32>
      %33 = arith.addf %25, %32 : vector<8x256xf32>
      %c15_i32 = arith.constant 15 : i32
      %34 = tpu.dynamic_rotate %16 by %c15_i32 dim 1 : vector<8x256xf32>, i32 -> vector<8x256xf32>
      %c0_23 = arith.constant 0 : index
      %c2 = arith.constant 2 : index
      %35 = vector.load %arg6[%c0_23, %c2] : memref<8x9xf32, #tpu.memory_space<vmem>>, vector<8x1xf32>
      %36 = vector.broadcast %35 : vector<8x1xf32> to vector<8x256xf32>
      %37 = arith.mulf %34, %36 : vector<8x256xf32>
      %c2_24 = arith.constant 2 : index
      %c0_25 = arith.constant 0 : index
      %38 = vector.load %arg8[%c2_24, %c0_25] : memref<9x256xf32, #tpu.memory_space<vmem>>, vector<1x256xf32>
      %39 = vector.broadcast %38 : vector<1x256xf32> to vector<8x256xf32>
      %40 = arith.mulf %37, %39 : vector<8x256xf32>
      %41 = arith.addf %33, %40 : vector<8x256xf32>
      %c1_i32 = arith.constant 1 : i32
      %42 = tpu.dynamic_rotate %16 by %c1_i32 dim 1 : vector<8x256xf32>, i32 -> vector<8x256xf32>
      %c0_26 = arith.constant 0 : index
      %c3 = arith.constant 3 : index
      %43 = vector.load %arg6[%c0_26, %c3] : memref<8x9xf32, #tpu.memory_space<vmem>>, vector<8x1xf32>
      %44 = vector.broadcast %43 : vector<8x1xf32> to vector<8x256xf32>
      %45 = arith.mulf %42, %44 : vector<8x256xf32>
      %c3_27 = arith.constant 3 : index
      %c0_28 = arith.constant 0 : index
      %46 = vector.load %arg8[%c3_27, %c0_28] : memref<9x256xf32, #tpu.memory_space<vmem>>, vector<1x256xf32>
      %47 = vector.broadcast %46 : vector<1x256xf32> to vector<8x256xf32>
      %48 = arith.mulf %45, %47 : vector<8x256xf32>
      %49 = arith.addf %41, %48 : vector<8x256xf32>
      %c0_29 = arith.constant 0 : index
      %c4 = arith.constant 4 : index
      %50 = vector.load %arg6[%c0_29, %c4] : memref<8x9xf32, #tpu.memory_space<vmem>>, vector<8x1xf32>
      %51 = vector.broadcast %50 : vector<8x1xf32> to vector<8x256xf32>
      %52 = arith.mulf %16, %51 : vector<8x256xf32>
      %53 = arith.addf %49, %52 : vector<8x256xf32>
      %c255_i32 = arith.constant 255 : i32
      %54 = tpu.dynamic_rotate %16 by %c255_i32 dim 1 : vector<8x256xf32>, i32 -> vector<8x256xf32>
      %c0_30 = arith.constant 0 : index
      %c5 = arith.constant 5 : index
      %55 = vector.load %arg6[%c0_30, %c5] : memref<8x9xf32, #tpu.memory_space<vmem>>, vector<8x1xf32>
      %56 = vector.broadcast %55 : vector<8x1xf32> to vector<8x256xf32>
      %57 = arith.mulf %54, %56 : vector<8x256xf32>
      %c5_31 = arith.constant 5 : index
      %c0_32 = arith.constant 0 : index
      %58 = vector.load %arg8[%c5_31, %c0_32] : memref<9x256xf32, #tpu.memory_space<vmem>>, vector<1x256xf32>
      %59 = vector.broadcast %58 : vector<1x256xf32> to vector<8x256xf32>
      %60 = arith.mulf %57, %59 : vector<8x256xf32>
      %61 = arith.addf %53, %60 : vector<8x256xf32>
      %c241_i32 = arith.constant 241 : i32
      %62 = tpu.dynamic_rotate %16 by %c241_i32 dim 1 : vector<8x256xf32>, i32 -> vector<8x256xf32>
      %c0_33 = arith.constant 0 : index
      %c6 = arith.constant 6 : index
      %63 = vector.load %arg6[%c0_33, %c6] : memref<8x9xf32, #tpu.memory_space<vmem>>, vector<8x1xf32>
      %64 = vector.broadcast %63 : vector<8x1xf32> to vector<8x256xf32>
      %65 = arith.mulf %62, %64 : vector<8x256xf32>
      %c6_34 = arith.constant 6 : index
      %c0_35 = arith.constant 0 : index
      %66 = vector.load %arg8[%c6_34, %c0_35] : memref<9x256xf32, #tpu.memory_space<vmem>>, vector<1x256xf32>
      %67 = vector.broadcast %66 : vector<1x256xf32> to vector<8x256xf32>
      %68 = arith.mulf %65, %67 : vector<8x256xf32>
      %69 = arith.addf %61, %68 : vector<8x256xf32>
      %c240_i32 = arith.constant 240 : i32
      %70 = tpu.dynamic_rotate %16 by %c240_i32 dim 1 : vector<8x256xf32>, i32 -> vector<8x256xf32>
      %c0_36 = arith.constant 0 : index
      %c7 = arith.constant 7 : index
      %71 = vector.load %arg6[%c0_36, %c7] : memref<8x9xf32, #tpu.memory_space<vmem>>, vector<8x1xf32>
      %72 = vector.broadcast %71 : vector<8x1xf32> to vector<8x256xf32>
      %73 = arith.mulf %70, %72 : vector<8x256xf32>
      %c7_37 = arith.constant 7 : index
      %c0_38 = arith.constant 0 : index
      %74 = vector.load %arg8[%c7_37, %c0_38] : memref<9x256xf32, #tpu.memory_space<vmem>>, vector<1x256xf32>
      %75 = vector.broadcast %74 : vector<1x256xf32> to vector<8x256xf32>
      %76 = arith.mulf %73, %75 : vector<8x256xf32>
      %77 = arith.addf %69, %76 : vector<8x256xf32>
      %c239_i32 = arith.constant 239 : i32
      %78 = tpu.dynamic_rotate %16 by %c239_i32 dim 1 : vector<8x256xf32>, i32 -> vector<8x256xf32>
      %c0_39 = arith.constant 0 : index
      %c8 = arith.constant 8 : index
      %79 = vector.load %arg6[%c0_39, %c8] : memref<8x9xf32, #tpu.memory_space<vmem>>, vector<8x1xf32>
      %80 = vector.broadcast %79 : vector<8x1xf32> to vector<8x256xf32>
      %81 = arith.mulf %78, %80 : vector<8x256xf32>
      %c8_40 = arith.constant 8 : index
      %c0_41 = arith.constant 0 : index
      %82 = vector.load %arg8[%c8_40, %c0_41] : memref<9x256xf32, #tpu.memory_space<vmem>>, vector<1x256xf32>
      %83 = vector.broadcast %82 : vector<1x256xf32> to vector<8x256xf32>
      %84 = arith.mulf %81, %83 : vector<8x256xf32>
      %85 = arith.addf %77, %84 : vector<8x256xf32>
      %c0_42 = arith.constant 0 : index
      %c0_43 = arith.constant 0 : index
      %86 = vector.load %arg7[%c0_42, %c0_43] : memref<8x1xf32, #tpu.memory_space<vmem>>, vector<8x1xf32>
      %87 = vector.broadcast %86 : vector<8x1xf32> to vector<8x256xf32>
      %88 = arith.addf %85, %87 : vector<8x256xf32>
      %c0_44 = arith.constant 0 : index
      %c0_45 = arith.constant 0 : index
      %c0_46 = arith.constant 0 : index
      %89 = vector.load %arg9[%c0_44, %c0_45, %c0_46] : memref<1x8x256xf32, #tpu.memory_space<vmem>>, vector<1x8x256xf32>
      %90 = vector.shape_cast %89 : vector<1x8x256xf32> to vector<8x256xf32>
      %91 = vector.shape_cast %88 : vector<8x256xf32> to vector<1x8x256xf32>
      tpu.vector_store %arg9[%c0_44, %c0_45, %c0_46], %91 {strides = array<i32>} : memref<1x8x256xf32, #tpu.memory_space<vmem>>, vector<1x8x256xf32>,
    } else {
    }
    return
  }
  func.func @transform_0(%arg0: i32, %arg1: i32, %arg2: i32) -> (i32, i32, i32) {
    %c0_i32 = arith.constant 0 : i32
    %c0_i32_0 = arith.constant 0 : i32
    return %arg0, %arg2, %c0_i32 : i32, i32, i32
  }
  func.func @transform_1(%arg0: i32, %arg1: i32, %arg2: i32) -> (i32, i32) {
    %c0_i32 = arith.constant 0 : i32
    return %arg1, %arg2 : i32, i32
  }
  func.func @transform_2(%arg0: i32, %arg1: i32, %arg2: i32) -> (i32, i32) {
    %c0_i32 = arith.constant 0 : i32
    %c0_i32_0 = arith.constant 0 : i32
    return %arg1, %c0_i32 : i32, i32
  }
  func.func @transform_3(%arg0: i32, %arg1: i32, %arg2: i32) -> (i32, i32) {
    %c0_i32 = arith.constant 0 : i32
    %c0_i32_0 = arith.constant 0 : i32
    return %arg1, %c0_i32 : i32, i32
  }
  func.func @transform_4(%arg0: i32, %arg1: i32, %arg2: i32) -> (i32, i32) {
    %c0_i32 = arith.constant 0 : i32
    %c0_i32_0 = arith.constant 0 : i32
    return %arg1, %c0_i32 : i32, i32
  }
  func.func @transform_5(%arg0: i32, %arg1: i32, %arg2: i32) -> (i32, i32) {
    %c0_i32 = arith.constant 0 : i32
    %c0_i32_0 = arith.constant 0 : i32
    %c0_i32_1 = arith.constant 0 : i32
    return %c0_i32, %c0_i32_0 : i32, i32
  }
  func.func @transform_6(%arg0: i32, %arg1: i32, %arg2: i32) -> (i32, i32, i32) {
    %c0_i32 = arith.constant 0 : i32
    %c0_i32_0 = arith.constant 0 : i32
    return %arg0, %arg1, %c0_i32 : i32, i32, i32
  }
}

</mosaic_0001>

<bundles_post_ra>
// kernel: tpu_custom_call.1
= control target key start
LH: loop header
LB: loop body
LE: loop exit
PB: predicated region body
PF: predicated region fallthrough
CT: control target
= control target key end

     0   :  { %s1524_s0 = inlined_call_operand.hbm [shape: f32[2,4,256], index: 0, kind: input, shape index: {}]   ;;  %s1525_s1 = inlined_call_operand.vmem [shape: f32[8,4], index: 1, kind: input, shape index: {}]   ;;  %s1526_s2 = inlined_call_operand.vmem [shape: f32[8,1], index: 2, kind: input, shape index: {}]   ;;  %s1527_s3 = inlined_call_operand.hbm [shape: f32[8,9], index: 3, kind: input, shape index: {}]   ;;  %s1528_s4 = inlined_call_operand.vmem [shape: f32[8,1], index: 4, kind: input, shape index: {}]   ;;  %s1529_s5 = inlined_call_operand.vmem [shape: f32[9,256], index: 5, kind: input, shape index: {}]   ;;  %s1530_s6 = inlined_call_operand.hbm [shape: f32[2,8,256], index: 6, kind: output, shape index: {}]  }
   0x1   :  { %1533 = sst [smem:[#allocation13_spill]] %s1527_s3 }
   0x2   :  { %11 = vsyncpa [#allocation4], 0 }
   0x3   :  { %13 = vsyncpa [#allocation4 + $0x1], 0 }
   0x4   :  { %14 = vsyncpa [#allocation7], 0 }
   0x5   :  { %15 = vsyncpa [#allocation5], 0 }
   0x6   :  { %17 = vsyncpa [#allocation5 + $0x1], 0  ;;  %s1239_s21 = smov 0   ;;  %s1241_s22 = smov 0  }
   0x7   :  { %s1243_s23 = smov 0   ;;  %s1245_s24 = smov 0  }
   0x8   :  { %s1247_s25 = smov 0   ;;  %s1249_s26 = smov 0  }
   0x9 LB: > { %s909_s27 = sadd.s32 4294967295, %s1181_s26   ;;  %s910_s28 = sadd.s32 4294967294, %s1181_s26   ;;  %s1181_s26 = sphi %s1249_s26, %s23_s26   ;;  %s1177_s25 = sphi %s1247_s25, %s1552_s25   ;;  %s1173_s24 = sphi %s1245_s24, %s1551_s24   ;;  %s1169_s23 = sphi %s1243_s23, %s1550_s23   ;;  %s1165_s22 = sphi %s1241_s22, %s1549_s22   ;;  %s1161_s21 = sphi %s1239_s21, %s1548_s21  }
   0xa   : > { %p64_p0 = scmp.ne.s32.totalorder %s1165_s22, %s1161_s21  ;;  %p1273_p1 = scmp.eq.s32.totalorder %s909_s27, 0 }
   0xb   : > { %p1277_p2 = scmp.eq.s32.totalorder %s909_s27, 1  ;;  %p223_p3 = scmp.eq.s32.totalorder %s910_s28, 1 }
   0xc   : > { %p1283_p4 = por %p1273_p1, %p64_p0  ;;  %p911_p5 = scmp.ge.s32.totalorder %s1181_s26, 1 }
   0xd   : > { %p1288_p6 = por %p223_p3, %p64_p0  ;;  %p230_p7 = scmp.lt.s32.totalorder %s1181_s26, 3 }
   0xe   : > { %s1536_s7 = scalar_select %p1283_p4, 1, 0 }
   0xf   : > { %s1537_s8 = scalar_select %p1288_p6, 1, 0 }
  0x10   : > { %p1293_p8 = pnand %p911_p5, %p230_p7  ;;  %s1183_s10 = smov [#allocation6]  }
  0x11   : > { %s262_s11 = sshll.u32 %s1183_s10, 4  ;;  %s42_s13 = sadd.s32 1, %s1177_s25  ;;  %s263_s11 = int_to_ptr.vmem [resolvable:$true] %s262_s11 }
  0x12   : > { %p949_p10 = pneg %p1293_p8  ;;  %s51_s14 = sadd.s32 1, %s1169_s23 }
  0x13   : > { %p44_p12 = scmp.ge.s32.totalorder %s42_s13, 2  ;;  %s1054_s15 = scalar_lea.vmem %s263_s11, 128 }
  0x14   : > { %p1302_p11 = pnand %p949_p10, %p1273_p1  ;;  %p1055_p0 = scmp.ne.s32.totalorder %s263_s11, %s1054_s15 }
  0x15   : > { %p1062_p7 = scmp.lt.s32.totalorder %s263_s11, %s263_s11  ;;  %p1063_p6 = scmp.lt.s32.totalorder %s1054_s15, %s1054_s15 }
  0x16   : > { %p1045_p13 = pneg %p1302_p11 }
  0x17   : > { %p1064_p9 = por %p1063_p6, %p1062_p7 }
  0x18   : > { %p1057_p3 = pnand %p1055_p0, %p1045_p13 }
  0x1a   : > { %p1058_p5 = pneg %p1057_p3 }
  0x1c   : > { %p1065_p4 = pnand %p1064_p9, %p1058_p5 }
  0x1e   : > { %1068 = shalt.err (!%p1065_p4)
}
  0x1f   : > { %s1540_s3 = sld [smem:[#allocation13_spill]]  ;;  %s1554_s13 = smov (%p44_p12, %s42_s13), 0 }
  0x20   : > { %1541 = sst [smem:[#allocation12_spill]] %s1554_s13  ;;  %p58_p6 = scmp.ne.s32.totalorder %s1169_s23, %s1165_s22 }
  0x21   : > { %p59_p4 = scmp.eq.s32.totalorder %s1181_s26, 0  ;;  %s46_s18 = ssub.s32 %s1177_s25, %s1554_s13 }
  0x22   : > { %p962_p9 = scmp.lt.s32.totalorder %s1181_s26, 2  ;;  %p49_p10 = scmp.eq.s32.totalorder %s46_s18, 0 }
  0x23   : > { %p60_p13 = por %p59_p4, %p58_p6  ;;  %p1325_p0 = por %p1277_p2, %p58_p6 }
  0x24   : > { %s283_s20 = sand.u32 1, %s1169_s23   ;;  %s939_s10 = sshll.u32 %s1177_s25, 7 }
  0x25   : > { %952 = dma.hbm_to_vmem [thread:$0]  (!%p1302_p11), %s1540_s3, 128, %s263_s11, [#allocation7]  }
  0x26   : > { %s1331_s27 = scalar_select %p49_p10, %s1169_s23, %s51_s14  }
  0x27   : > { %s917_s28 = sshll.u32 %s283_s20, 3  ;;  %s295_s15 = scalar_lea.hbm %s1524_s0, %s939_s10 }
  0x28   : > { %s287_s16 = scalar_lea.vmem [#allocation3], %s917_s28  ;;  %p1337_p11 = pnand %p962_p9, %p60_p13 }
  0x29   : > { %s297_s17 = sshll.u32 %s287_s16, 4  ;;  %s284_s30 = scalar_lea.sflag [#allocation4], %s283_s20  ;;  %s298_s17 = int_to_ptr.vmem [resolvable:$true] %s297_s17 }
  0x2a   : > { %p1071_p2 = pneg %p1337_p11  ;;  %s1082_s3 = scalar_lea.vmem %s298_s17, 128 }
  0x2b   : > { %p1083_p12 = scmp.ne.s32.totalorder %s298_s17, %s1082_s3  ;;  %s1184_s14 = smov [#allocation3]  }
  0x2c   : > { %s1087_s13 = sshll.u32 %s1184_s14, 4  ;;  %s1088_s13 = int_to_ptr.vmem [resolvable:$false] %s1087_s13 }
  0x2d   : > { %p1085_p3 = pnand %p1083_p12, %p1071_p2  ;;  %s1089_s11 = scalar_lea.vmem %s1088_s13, 256 }
  0x2e   : > { %p1090_p7 = scmp.lt.s32.totalorder %s298_s17, %s1088_s13  ;;  %p1091_p6 = scmp.lt.s32.totalorder %s1089_s11, %s1082_s3 }
  0x2f   : > { %p1086_p5 = pneg %p1085_p3 }
  0x30   : > { %p1092_p4 = por %p1091_p6, %p1090_p7 }
  0x32   : > { %p1093_p10 = pnand %p1092_p4, %p1086_p5 }
  0x34   : > { %1096 = shalt.err (!%p1093_p10)
}
  0x35   : > { %956 = dma.hbm_to_vmem [thread:$0]  (!%p1337_p11), %s295_s15, 128, %s298_s17, %s284_s30  }
  0x36   : > { %306 = sbr.rel (%p1293_p8) target bundleno = 439 (0x1b7), region = 44  ;;  %s1348_s20 = sand.u32 (!%p1293_p8), 1, %s1165_s22  }
  0x37   : > { %s921_s28 = sshll.u32 (!%p1293_p8), %s1348_s20, 3  ;;  %s309_s10 = scalar_lea.sflag (!%p1293_p8), [#allocation4], %s1348_s20 }
  0x38   : > { %s312_s12 = scalar_lea.vmem (!%p1293_p8), [#allocation3], %s921_s28  ;;  %p1544_p9 = scmp.ne.s32.totalorder (!%p1293_p8), %s1536_s7, 0 }
  0x3b   : > { %1148 = dma.done.wait (%p1544_p9), %s309_s10, 128  }
  0x3c   : > { %1150 = vsyncadd (%p1544_p9), %s309_s10, 4294967168 }
  0x3d   : > { %1152 = dma.done.wait (%p1273_p1), [#allocation7], 128  }
  0x3e   : > { %1154 = vsyncadd (%p1273_p1), [#allocation7], 4294967168  ;;  %v1185_v0 = vmov 0.0   ;;  %v1186_v1 = vmov 0   ;;  %v1187_v2 = vmov 1   ;;  %v384_v3 = vld [vmem:[%s312_s12] sm:$0xff]  ;;  %v488_v32 = vlaneseq }
  0x3f   : > { %460 = vmatprep.mubr.f32.mxu0 %v1185_v0  ;;  %1032 = vset.pattern.permute.xlu0 %v1186_v1  ;;  %vm391_vm0 = vcmask 1043456   ;;  %v476_v4 = vld [vmem:[%s1526_s2] sm:$0xff]  ;;  %v386_v5 = vcombine.high %v384_v3, %v384_v3  ;;  %v493_v6 = vld [vmem:[#allocation6] sm:$0xff]  ;;  %vm387_vm1 = vcmask 31744   ;;  %v1188_v8 = vmov 3   ;;  %s1195_s29 = smov 15  }
  0x40   : > { %1033 = vset.pattern.permute.xlu1 %v1187_v2  ;;  %479 = vperm.xlu0 %1032, %v476_v4   ;;  %v383_v7 = vld [vmem:[%s1525_s1] sm:$0xff]  ;;  %v1189_v9 = vmov 2   ;;  %v1190_v10 = vmov 4   ;;  %v1191_v11 = vmov 5   ;;  %v1192_v12 = vmov 7   ;;  %s1196_s15 = smov 17  }
  0x41   : > { %525 = vperm.xlu1 %1033, %v493_v6   ;;  %924 = vmatprep.subr.msk.mxu0 %vm391_vm0, %v386_v5  ;;  %v1193_v13 = vmov 6   ;;  %v1194_v14 = vmov 8   ;;  %s1197_s16 = smov 113   ;;  %s1198_s17 = smov 16   ;;  %v735_v20 = vld [vmem:[%s1528_s4] sm:$0xff]  ;;  %v1403_v35 = vand.u32 127, %v488_v32 }
  0x42   : > { %925 = vmatpush1.msk.msra.mxu0 %vm391_vm0, %v384_v3  ;;  %s1199_s18 = smov 112   ;;  %s1200_s30 = smov 1   ;;  %v504_v36 = vshrl.u32 %v488_v32, 7  ;;  %v501_v41 = vld [vmem:[%s1529_s5] ss:$8 sm:$0x3] }
  0x43   : > { %926 = vmatmul.mubr.msk.f32.vlgmr.msra.gmra.mxu0 %vm387_vm1, %v383_v7  ;;  %s1201_s14 = smov 127   ;;  %s1202_s11 = smov 111   ;;  %vm521_vm2 = vcmp.lt.s32.totalorder %v1403_v35, 16  ;;  %vm490_vm3 = vcmp.lt.s32.totalorder %v1403_v35, 17  ;;  %vm551_vm4 = vcmp.lt.s32.totalorder %v1403_v35, 15  ;;  %vm581_vm5 = vcmp.lt.s32.totalorder %v1403_v35, 1 }
  0x44   : > { %1035 = vset.pattern.permute.xlu0 %v1188_v8  ;;  %v1407_v38 = vsub.s32 0, %v504_v36  ;;  %v1409_v39 = vsub.s32 1, %v504_v36  ;;  %v927_v42 = vld [vmem:[%s1529_s5 + $0x1] ss:$8 sm:$0x3]  ;;  %vm619_vm6 = vcmp.lt.s32.totalorder %v1403_v35, 127 }
  0x45   : > { %585 = vperm.xlu0 %1035, %v493_v6   ;;  %1034 = vset.pattern.permute.xlu1 %v1189_v9  ;;  %v928_v46 = vld [vmem:[%s1529_s5 + $0x2] ss:$8 sm:$0x3]  ;;  %v929_v57 = vld [vmem:[%s1529_s5 + $0x3] ss:$8 sm:$0x3] }
  0x46   : > { %555 = vperm.xlu1 %1034, %v493_v6   ;;  %v506_v49 = vrot.slane %v501_v41, %v1407_v38  ;;  %v510_v50 = vrot.slane %v501_v41, %v1409_v39  ;;  %v536_v51 = vrot.slane %v927_v42, %v1407_v38  ;;  %v540_v52 = vrot.slane %v927_v42, %v1409_v39  ;;  %s923_s3 = sshll.u32 %s1348_s20, 4  ;;  %s940_s9 = sshll.u32 %s1173_s24, 8 }
  0x47   : > { %v566_v55 = vrot.slane %v928_v46, %v1407_v38  ;;  %v570_v63 = vrot.slane %v928_v46, %v1409_v39  ;;  %v596_v2 = vrot.slane %v929_v57, %v1407_v38  ;;  %v600_v5 = vrot.slane %v929_v57, %v1409_v39  ;;  %s359_s7 = scalar_lea.vmem [#allocation8], %s923_s3  ;;  %s1203_s24 = smov [#allocation8]  }
  0x48   : > { %vm649_vm7 = vcmp.lt.s32.totalorder %v1403_v35, 113  ;;  %vm679_vm8 = vcmp.lt.s32.totalorder %v1403_v35, 112  ;;  %vm709_vm9 = vcmp.lt.s32.totalorder %v1403_v35, 111  ;;  %s762_s13 = sshll.u32 %s359_s7, 4  ;;  %s763_s13 = int_to_ptr.vmem [resolvable:$true] %s762_s13 }
  0x49   : > { %1036 = vset.pattern.permute.xlu0 %v1190_v10 }
  0x4a   : > { %608 = vperm.xlu0 %1036, %v493_v6   ;;  %1037 = vset.pattern.permute.xlu1 %v1191_v11 }
  0x4b   : > { %623 = vperm.xlu1 %1037, %v493_v6  }
  0x4e   : > { %1039 = vset.pattern.permute.xlu0 %v1192_v12 }
  0x4f   : > { %683 = vperm.xlu0 %1039, %v493_v6   ;;  %1038 = vset.pattern.permute.xlu1 %v1193_v13 }
  0x50   : > { %653 = vperm.xlu1 %1038, %v493_v6  }
  0x53   : > { %1040 = vset.pattern.permute.xlu0 %v1194_v14 }
  0x54   : > { %713 = vperm.xlu0 %1040, %v493_v6  }
  0x58   : > { %1041 = vset.pattern.permute.xlu0 %v1186_v1 }
  0x59   : > { %496 = vperm.xlu0 %1041, %v493_v6  }
  0xbb   : > { %v480_v15 = vpop.permute.xlu0 %479 }
  0xbc   : > { %v526_v21 = vpop.permute.xlu1 %525 }
  0xc0   : > { %v586_v22 = vpop.permute.xlu0 %585 }
  0xc1   : > { %v556_v23 = vpop.permute.xlu1 %555 }
  0xc5   : > { %v1389_v24 = vpop.permute.xlu0 %608 }
  0xc6   : > { %v1391_v25 = vpop.permute.xlu1 %623 }
  0xca   : > { %v1393_v26 = vpop.permute.xlu0 %683 }
  0xcb   : > { %v1395_v27 = vpop.permute.xlu1 %653 }
  0xcf   : > { %v1397_v28 = vpop.permute.xlu0 %713 }
  0xd4   : > { %v497_v30 = vpop.permute.xlu0 %496 }
 0x103   : > { %v462_v16 = vpop.f32.mrf.mxu0 }
 0x104   : > { %v1366_v17 = vadd.f32 %v480_v15, %v462_v16 }
 0x105   : > { %v464_v18 = vpop.f32.mrf.mxu0 }
 0x106   : > { %547 = vrot.lane.b32.xlu1 %v1366_v17, %s1195_s29  ;;  %484 = vrot.lane.b32.xlu0 %v1366_v17, %s1196_s15  ;;  %v1374_v19 = vadd.f32 %v480_v15, %v464_v18 }
 0x10a   : > { %645 = vrot.lane.b32.xlu1 %v1366_v17, %s1197_s16  ;;  %517 = vrot.lane.b32.xlu0 %v1366_v17, %s1198_s17 }
 0x10e   : > { %675 = vrot.lane.b32.xlu1 %v1366_v17, %s1199_s18  ;;  %577 = vrot.lane.b32.xlu0 %v1366_v17, %s1200_s30 }
 0x112   : > { %615 = vrot.lane.b32.xlu0 %v1366_v17, %s1201_s14  ;;  %486 = vrot.lane.b32.xlu1 %v1374_v19, %s1196_s15 }
 0x116   : > { %705 = vrot.lane.b32.xlu0 %v1366_v17, %s1202_s11  ;;  %519 = vrot.lane.b32.xlu1 %v1374_v19, %s1198_s17  ;;  %s746_s17 = scalar_lea.sflag [#allocation5], %s1348_s20 }
 0x11a   : > { %738 = vperm.xlu0 %1041, %v735_v20   ;;  %549 = vrot.lane.b32.xlu1 %v1374_v19, %s1195_s29 }
 0x11e   : > { %579 = vrot.lane.b32.xlu1 %v1374_v19, %s1200_s30  ;;  %s1101_s30 = sshll.u32 %s1203_s24, 4  ;;  %s1102_s30 = int_to_ptr.vmem [resolvable:$false] %s1101_s30 }
 0x11f   : > { %p1104_p11 = scmp.lt.s32.totalorder %s763_s13, %s1102_s30 }
 0x122   : > { %617 = vrot.lane.b32.xlu1 %v1374_v19, %s1201_s14  ;;  %s1103_s14 = scalar_lea.vmem %s1102_s30, 512 }
 0x126   : > { %647 = vrot.lane.b32.xlu1 %v1374_v19, %s1197_s16  ;;  %s1482_s16 = scalar_lea.hbm %s1530_s6, %s940_s9 }
 0x12a   : > { %677 = vrot.lane.b32.xlu1 %v1374_v19, %s1199_s18  ;;  %s1097_s18 = scalar_lea.vmem %s763_s13, 256 }
 0x12b   : > { %p1098_p1 = scmp.ne.s32.totalorder %s763_s13, %s1097_s18  ;;  %p1105_p2 = scmp.lt.s32.totalorder %s1103_s14, %s1097_s18 }
 0x12d   : > { %p1099_p8 = pnand %p1098_p1, %p1325_p0  ;;  %p1106_p12 = por %p1105_p2, %p1104_p11 }
 0x12e   : > { %707 = vrot.lane.b32.xlu1 %v1374_v19, %s1202_s11 }
 0x12f   : > { %p1100_p13 = pneg %p1099_p8 }
 0x131   : > { %p1107_p3 = pnand %p1106_p12, %p1100_p13 }
 0x178   : > { %v548_v29 = vpop.permute.xlu1 %547  ;;  %v485_v34 = vpop.permute.xlu0 %484 }
 0x17c   : > { %v1399_v31 = vpop.permute.xlu1 %645  ;;  %v518_v40 = vpop.permute.xlu0 %517 }
 0x180   : > { %v1401_v33 = vpop.permute.xlu1 %675  ;;  %v578_v62 = vpop.permute.xlu0 %577 }
 0x184   : > { %v487_v37 = vpop.permute.xlu1 %486  ;;  %v616_v15 = vpop.permute.xlu0 %615 }
 0x185   : > { %v491_v47 = vsel %vm490_vm3, %v485_v34, %v487_v37  ;;  %v492_v48 = vsel %vm490_vm3, %v487_v37, %v485_v34  ;;  %v611_v37 = vmul.f32 %v1389_v24, %v1366_v17 }
 0x186   : > { %v499_v58 = vmul.f32 %v497_v30, %v492_v48  ;;  %v500_v59 = vmul.f32 %v497_v30, %v491_v47  ;;  %v932_v47 = vld [vmem:[%s1529_s5 + $0x7] ss:$8 sm:$0x3]  ;;  %v612_v48 = vmul.f32 %v1389_v24, %v1374_v19 }
 0x188   : > { %v520_v43 = vpop.permute.xlu1 %519  ;;  %v513_v7 = vmul.f32 %v506_v49, %v499_v58  ;;  %v514_v8 = vmul.f32 %v510_v50, %v500_v59 }
 0x189   : > { %v522_v44 = vsel %vm521_vm2, %v518_v40, %v520_v43  ;;  %v523_v45 = vsel %vm521_vm2, %v520_v43, %v518_v40 }
 0x18a   : > { %v528_v53 = vmul.f32 %v526_v21, %v523_v45  ;;  %v529_v54 = vmul.f32 %v526_v21, %v522_v44 }
 0x18c   : > { %v550_v56 = vpop.permute.xlu1 %549  ;;  %v543_v3 = vmul.f32 %v536_v51, %v528_v53  ;;  %v544_v4 = vmul.f32 %v540_v52, %v529_v54  ;;  %v694_v53 = vrot.slane %v932_v47, %v1407_v38  ;;  %v698_v54 = vrot.slane %v932_v47, %v1409_v39 }
 0x18d   : > { %v552_v60 = vsel %vm551_vm4, %v548_v29, %v550_v56  ;;  %v553_v61 = vsel %vm551_vm4, %v550_v56, %v548_v29 }
 0x18e   : > { %v558_v0 = vmul.f32 %v556_v23, %v553_v61  ;;  %v559_v1 = vmul.f32 %v556_v23, %v552_v60  ;;  %v545_v16 = vadd.f32 %v543_v3, %v513_v7  ;;  %v546_v18 = vadd.f32 %v544_v4, %v514_v8  ;;  %v930_v23 = vld [vmem:[%s1529_s5 + $0x5] ss:$8 sm:$0x3] }
 0x18f   : > { %v634_v40 = vrot.slane %v930_v23, %v1407_v38  ;;  %v638_v41 = vrot.slane %v930_v23, %v1409_v39 }
 0x190   : > { %v580_v6 = vpop.permute.xlu1 %579  ;;  %v573_v11 = vmul.f32 %v566_v55, %v558_v0  ;;  %v574_v12 = vmul.f32 %v570_v63, %v559_v1  ;;  %v706_v1 = vpop.permute.xlu0 %705 }
 0x191   : > { %v582_v9 = vsel %vm581_vm5, %v578_v62, %v580_v6  ;;  %v583_v10 = vsel %vm581_vm5, %v580_v6, %v578_v62 }
 0x192   : > { %v588_v13 = vmul.f32 %v586_v22, %v583_v10  ;;  %v589_v14 = vmul.f32 %v586_v22, %v582_v9  ;;  %v575_v34 = vadd.f32 %v573_v11, %v545_v16  ;;  %v576_v36 = vadd.f32 %v574_v12, %v546_v18  ;;  %v931_v22 = vld [vmem:[%s1529_s5 + $0x6] ss:$8 sm:$0x3] }
 0x193   : > { %v664_v17 = vrot.slane %v931_v22, %v1407_v38  ;;  %v668_v51 = vrot.slane %v931_v22, %v1409_v39 }
 0x194   : > { %v603_v20 = vmul.f32 %v596_v2, %v588_v13  ;;  %v604_v21 = vmul.f32 %v600_v5, %v589_v14  ;;  %v618_v29 = vpop.permute.xlu1 %617 }
 0x195   : > { %v620_v30 = vsel %vm619_vm6, %v616_v15, %v618_v29  ;;  %v621_v32 = vsel %vm619_vm6, %v618_v29, %v616_v15  ;;  %v739_v14 = vpop.permute.xlu0 %738 }
 0x196   : > { %v605_v42 = vadd.f32 %v603_v20, %v575_v34  ;;  %v606_v43 = vadd.f32 %v604_v21, %v576_v36  ;;  %v626_v44 = vmul.f32 %v1391_v25, %v620_v30  ;;  %v627_v45 = vmul.f32 %v1391_v25, %v621_v32 }
 0x198   : > { %v648_v46 = vpop.permute.xlu1 %647  ;;  %v613_v19 = vadd.f32 %v611_v37, %v605_v42  ;;  %v614_v24 = vadd.f32 %v612_v48, %v606_v43  ;;  %v641_v55 = vmul.f32 %v634_v40, %v626_v44  ;;  %v642_v56 = vmul.f32 %v638_v41, %v627_v45 }
 0x199   : > { %v650_v49 = vsel %vm649_vm7, %v1399_v31, %v648_v46  ;;  %v651_v50 = vsel %vm649_vm7, %v648_v46, %v1399_v31  ;;  %v933_v31 = vld [vmem:[%s1529_s5 + $0x10] ss:$8 sm:$0x3] }
 0x19a   : > { %v656_v52 = vmul.f32 %v1395_v27, %v650_v49  ;;  %v657_v25 = vmul.f32 %v1395_v27, %v651_v50  ;;  %v724_v63 = vrot.slane %v933_v31, %v1407_v38  ;;  %v728_v0 = vrot.slane %v933_v31, %v1409_v39 }
 0x19b   : > { %v643_v2 = vadd.f32 %v641_v55, %v613_v19  ;;  %v644_v3 = vadd.f32 %v642_v56, %v614_v24 }
 0x19c   : > { %v678_v57 = vpop.permute.xlu1 %677  ;;  %v671_v59 = vmul.f32 %v664_v17, %v656_v52  ;;  %v672_v60 = vmul.f32 %v668_v51, %v657_v25 }
 0x19d   : > { %v680_v58 = vsel %vm679_vm8, %v1401_v33, %v678_v57  ;;  %v681_v27 = vsel %vm679_vm8, %v678_v57, %v1401_v33 }
 0x19e   : > { %v686_v61 = vmul.f32 %v1393_v26, %v680_v58  ;;  %v687_v62 = vmul.f32 %v1393_v26, %v681_v27  ;;  %v673_v7 = vadd.f32 %v671_v59, %v643_v2  ;;  %v674_v8 = vadd.f32 %v672_v60, %v644_v3 }
 0x1a0   : > { %v701_v4 = vmul.f32 %v694_v53, %v686_v61  ;;  %v702_v5 = vmul.f32 %v698_v54, %v687_v62  ;;  %v708_v33 = vpop.permute.xlu1 %707 }
 0x1a1   : > { %v710_v6 = vsel %vm709_vm9, %v706_v1, %v708_v33  ;;  %v711_v35 = vsel %vm709_vm9, %v708_v33, %v706_v1 }
 0x1a2   : > { %v716_v9 = vmul.f32 %v1397_v28, %v710_v6  ;;  %v717_v26 = vmul.f32 %v1397_v28, %v711_v35  ;;  %v703_v10 = vadd.f32 %v701_v4, %v673_v7  ;;  %v704_v38 = vadd.f32 %v702_v5, %v674_v8 }
 0x1a4   : > { %v731_v39 = vmul.f32 %v724_v63, %v716_v9  ;;  %v732_v11 = vmul.f32 %v728_v0, %v717_v26 }
 0x1a6   : > { %v733_v12 = vadd.f32 %v731_v39, %v703_v10  ;;  %v734_v13 = vadd.f32 %v732_v11, %v704_v38 }
 0x1a8   : > { %v741_v15 = vadd.f32 %v739_v14, %v733_v12  ;;  %v742_v16 = vadd.f32 %v739_v14, %v734_v13 }
 0x1aa   : > { %743 = vst [vmem:[%s359_s7] sm:$0xff] %v741_v15  ;;  %744 = vst [vmem:[%s359_s7 + $0x8] sm:$0xff] %v742_v16 }
 0x1ab   : > { %1110 = shalt.err (!%p1107_p3)
}
 0x1ac   : > { %s1111_s11 = scalar_lea.hbm %s1482_s16, 256  ;;  %s1115_s10 = scalar_lea.hbm %s1530_s6, 512 }
 0x1ad   : > { %p1112_p5 = scmp.ne.s32.totalorder %s1482_s16, %s1111_s11  ;;  %p1116_p4 = scmp.lt.s32.totalorder %s1482_s16, %s1530_s6 }
 0x1ae   : > { %p1117_p10 = scmp.lt.s32.totalorder %s1115_s10, %s1111_s11 }
 0x1af   : > { %p1113_p7 = pnand %p1112_p5, %p1325_p0 }
 0x1b0   : > { %p1118_p9 = por %p1117_p10, %p1116_p4 }
 0x1b1   : > { %p1114_p6 = pneg %p1113_p7 }
 0x1b3   : > { %p1119_p1 = pnand %p1118_p9, %p1114_p6 }
 0x1b5   : > { %1122 = shalt.err (!%p1119_p1)
}
 0x1b6   : > { %947 = dma.vmem_to_hbm [thread:$0]  (%p1325_p0), %s763_s13, 256, %s1482_s16, %s746_s17  }
 0x1b7 PF: > { %s774_s9 = sand.u32 1, %s1161_s21   ;;  %p1545_p8 = scmp.ne.s32.totalorder %s1537_s8, 0 }
 0x1b8   : > { %p1546_p13 = scmp.ge.s32.totalorder %s1181_s26, 2  ;;  %s775_s7 = scalar_lea.sflag [#allocation5], %s774_s9 }
 0x1ba   : > { %p958_p11 = pnand %p1546_p13, %p1545_p8 }
 0x1bc   : > { %p959_p2 = pneg %p958_p11 }
 0x1be   : > { %1156 = dma.done.wait (%p959_p2), %s775_s7, 256  }
 0x1bf   : > { %1158 = vsyncadd (%p959_p2), %s775_s7, 4294967040  ;;  %s23_s26 = sadd.s32 1, %s1181_s26   ;;  %s1547_s19 = sld [smem:[#allocation12_spill]] }
 0x1c0   : > { %p20_p12 = scmp.ge.s32.totalorder %s23_s26, 4   ;;  %s1548_s21 = smov %s1165_s22 }
 0x1c1   : > { %s1549_s22 = smov %s1169_s23  ;;  %s1550_s23 = smov %s1331_s27 }
 0x1c2   : > { %s1551_s24 = smov %s1177_s25  ;;  %22 = sbr.rel (!%p20_p12) target bundleno = 9 (0x9), region = 118 }
 0x1c5   : > { %s1552_s25 = smov %s1547_s19 }
 0x1c7   :  { %780 = vsyncpa [#allocation4], 1 }
 0x1c8   :  { %782 = vsyncpa [#allocation4 + $0x1], 1 }
 0x1c9   :  { %783 = vsyncpa [#allocation7], 1 }
 0x1ca   :  { %784 = vsyncpa [#allocation5], 1 }
 0x1cb   :  { %786 = vsyncpa [#allocation5 + $0x1], 1 }

</bundles_post_ra>
